<compile_context>
chip_gen: v6e
topology: v6e:2x2x1
jax: 0.10.0
libtpu: 0.0.40
codegen_flags: <defaults>
</compile_context>

<pallas_src>
import jax
import jax.numpy as jnp
from jax.experimental import pallas as pl
from jax.experimental.pallas import tpu as pltpu

_LANE = 128


def normalize_kernel(x_ref, scale_ref, bias_ref, o_ref):
    # x_ref: (BR, BL) tile in the ORIGINAL dtype (e.g. uint8 or f32).
    # scale_ref / bias_ref: (BR, 1) per-row f32 constants (row = (n, c) plane).
    # Widening to f32 happens here so only narrow bytes cross HBM on the read.
    x = x_ref[...].astype(jnp.float32)
    o_ref[...] = x * scale_ref[...] + bias_ref[...]


def _choose_blocks(R, L, in_itemsize, target_block_bytes):
    """Pick a lane-dense (BR, BL) block, sized by the f32 output tile."""
    out_itemsize = 4                                   # kernel writes float32
    blk_itemsize = max(in_itemsize, out_itemsize)
    # Sublane multiple that keeps tiles of the *input* dtype unmasked.
    sub = {1: 32, 2: 16}.get(in_itemsize, 8)

    # Lane (last-dim) block: a multiple of 128, or the full extent (always
    # legal even when L % 128 != 0). A partial trailing tile is a masked store.
    max_lanes = max(_LANE,
                    ((target_block_bytes // (sub * blk_itemsize)) // _LANE) * _LANE)
    BL = L if L <= max_lanes else max_lanes

    # Row (sublane) block: the full extent if it fits the byte budget,
    # otherwise a multiple of `sub` (partial trailing tile is masked).
    rows_fit = max(1, target_block_bytes // (BL * blk_itemsize))
    BR = R if rows_fit >= R else max(sub, (rows_fit // sub) * sub)

    # Keep >= 2 blocks so v7x's two TensorCores both get work (harmless on
    # v5e/v6e); only bother when the tensor is big enough to matter.
    if (pl.cdiv(R, BR) * pl.cdiv(L, BL) < 2
            and R * L * blk_itemsize > (512 << 10)):
        if BL % (2 * _LANE) == 0:
            BL //= 2
        elif BR % (2 * sub) == 0:
            BR //= 2
    return BR, BL


def normalize(x, mean, std, *, target_block_bytes=4 * 1024 * 1024):
    """Pallas equivalent of Normalize.forward: ((x / 255) - mean[c]) / std[c].

    Accepts integer (e.g. uint8 image) or floating NCHW input; the widen to
    float32 happens inside the kernel.  Output is float32, matching PyTorch.
    """
    N, C, H, W = x.shape
    assert mean.shape == (C,) and std.shape == (C,)
    in_itemsize = jnp.dtype(x.dtype).itemsize

    # Fold ((x/255) - mean) / std into one per-channel mul-add, in float32
    # regardless of input dtype (keeps the folded form numerically tight).
    mean32 = jnp.asarray(mean, jnp.float32)
    std32 = jnp.asarray(std, jnp.float32)
    scale_c = 1.0 / (255.0 * std32)              # (C,)
    bias_c = -mean32 / std32                     # (C,)

    R = N * C                                    # one row per (n, c) plane
    L = H * W                                    # lane-dense flattened spatial
    x2 = x.reshape(R, L)                         # free reshape of contiguous NCHW

    # Per-row scale/bias, shape (R, 1): row r -> channel r % C.  Tiny arrays,
    # so channel boundaries can never be straddled by a block.
    scale_rows = jnp.tile(scale_c, N).reshape(R, 1)
    bias_rows = jnp.tile(bias_c, N).reshape(R, 1)

    BR, BL = _choose_blocks(R, L, in_itemsize, target_block_bytes)
    grid = (pl.cdiv(R, BR), pl.cdiv(L, BL))

    total_elems = N * C * H * W
    cost = pl.CostEstimate(
        flops=2 * total_elems,
        transcendentals=0,
        bytes_accessed=total_elems * (in_itemsize + 4),
    )

    out2 = pl.pallas_call(
        normalize_kernel,
        out_shape=jax.ShapeDtypeStruct((R, L), jnp.float32),
        grid=grid,
        in_specs=[
            pl.BlockSpec((BR, BL), lambda i, j: (i, j)),   # x (original dtype)
            pl.BlockSpec((BR, 1), lambda i, j: (i, 0)),    # per-row scale (f32)
            pl.BlockSpec((BR, 1), lambda i, j: (i, 0)),    # per-row bias  (f32)
        ],
        out_specs=pl.BlockSpec((BR, BL), lambda i, j: (i, j)),
        compiler_params=pltpu.CompilerParams(
            dimension_semantics=("parallel", "parallel"),
            vmem_limit_bytes=40 * 1024 * 1024,
        ),
        cost_estimate=cost,
    )(x2, scale_rows, bias_rows)

    return out2.reshape(N, C, H, W)


def normalize_ref(x, mean, std):
    x = x / 255.0
    m = mean.reshape(1, 3, 1, 1)
    s = std.reshape(1, 3, 1, 1)
    return (x - m) / s


if __name__ == "__main__":
    key = jax.random.PRNGKey(0)
    # Deterministic "buffers" (module __init__ takes mean/std of length 3).
    mean = jnp.asarray([0.485, 0.456, 0.406], dtype=jnp.float32)
    std = jnp.asarray([0.229, 0.224, 0.225], dtype=jnp.float32)

    # Float input path (small NCHW, 3 channels as the forward implies).
    x = jax.random.uniform(key, (2, 3, 16, 16), dtype=jnp.float32) * 255.0
    out = jax.block_until_ready(normalize(x, mean, std))
    ref = normalize_ref(x, mean, std)
    assert out.shape == ref.shape and out.dtype == ref.dtype
    assert jnp.allclose(out, ref, atol=1e-5, rtol=1e-5)

    # uint8 image path: widening happens inside the kernel (narrow HBM read).
    x_u8 = jnp.round(jax.random.uniform(key, (2, 3, 16, 16)) * 255.0).astype(jnp.uint8)
    out_u8 = jax.block_until_ready(normalize(x_u8, mean, std))
    ref_u8 = normalize_ref(x_u8.astype(jnp.float32), mean, std)
    assert out_u8.dtype == jnp.float32
    assert jnp.allclose(out_u8, ref_u8, atol=1e-5, rtol=1e-5)

    print("KERNEL_OK")
</pallas_src>

<mosaic_0001>
module attributes {stable_mosaic.version = 11 : i64} {
  func.func @normalize_kernel(%arg0: i32, %arg1: i32, %arg2: memref<6x256xf32, #tpu.memory_space<vmem>>, %arg3: memref<6x1xf32, #tpu.memory_space<vmem>>, %arg4: memref<6x1xf32, #tpu.memory_space<vmem>>, %arg5: memref<6x256xf32, #tpu.memory_space<vmem>>) attributes {dimension_semantics = [#tpu.dimension_semantics<parallel>, #tpu.dimension_semantics<parallel>], iteration_bounds = array<i64: 1, 1>, scalar_prefetch = 0 : i64, scratch_operands = 0 : i64, tpu.core_type = #tpu.core_type<tc>, window_params = [{transform_indices = @transform_0, window_bounds = array<i64: 6, 256>}, {transform_indices = @transform_1, window_bounds = array<i64: 6, 1>}, {transform_indices = @transform_2, window_bounds = array<i64: 6, 1>}, {transform_indices = @transform_3, window_bounds = array<i64: 6, 256>}]} {
    %c0 = arith.constant 0 : index
    %c0_0 = arith.constant 0 : index
    %0 = vector.load %arg2[%c0, %c0_0] : memref<6x256xf32, #tpu.memory_space<vmem>>, vector<6x256xf32>
    %c0_1 = arith.constant 0 : index
    %c0_2 = arith.constant 0 : index
    %1 = vector.load %arg3[%c0_1, %c0_2] : memref<6x1xf32, #tpu.memory_space<vmem>>, vector<6x1xf32>
    %2 = vector.broadcast %1 : vector<6x1xf32> to vector<6x256xf32>
    %3 = arith.mulf %0, %2 : vector<6x256xf32>
    %c0_3 = arith.constant 0 : index
    %c0_4 = arith.constant 0 : index
    %4 = vector.load %arg4[%c0_3, %c0_4] : memref<6x1xf32, #tpu.memory_space<vmem>>, vector<6x1xf32>
    %5 = vector.broadcast %4 : vector<6x1xf32> to vector<6x256xf32>
    %6 = arith.addf %3, %5 : vector<6x256xf32>
    %c0_5 = arith.constant 0 : index
    %c0_6 = arith.constant 0 : index
    %7 = vector.load %arg5[%c0_5, %c0_6] : memref<6x256xf32, #tpu.memory_space<vmem>>, vector<6x256xf32>
    tpu.vector_store %arg5[%c0_5, %c0_6], %6 {strides = array<i32>} : memref<6x256xf32, #tpu.memory_space<vmem>>, vector<6x256xf32>,
    return
  }
  func.func @transform_0(%arg0: i32, %arg1: i32) -> (i32, i32) {
    %c0_i32 = arith.constant 0 : i32
    return %arg0, %arg1 : i32, i32
  }
  func.func @transform_1(%arg0: i32, %arg1: i32) -> (i32, i32) {
    %c0_i32 = arith.constant 0 : i32
    %c0_i32_0 = arith.constant 0 : i32
    return %arg0, %c0_i32 : i32, i32
  }
  func.func @transform_2(%arg0: i32, %arg1: i32) -> (i32, i32) {
    %c0_i32 = arith.constant 0 : i32
    %c0_i32_0 = arith.constant 0 : i32
    return %arg0, %c0_i32 : i32, i32
  }
  func.func @transform_3(%arg0: i32, %arg1: i32) -> (i32, i32) {
    %c0_i32 = arith.constant 0 : i32
    return %arg0, %arg1 : i32, i32
  }
}

</mosaic_0001>

<bundles_post_ra>
// kernel: tpu_custom_call.1
= control target key start
LH: loop header
LB: loop body
LE: loop exit
PB: predicated region body
PF: predicated region fallthrough
CT: control target
= control target key end

     0   :  { %v74_v1 = vmov 0   ;;  %s111_s0 = inlined_call_operand.vmem [shape: f32[6,256], index: 0, kind: input, shape index: {}]   ;;  %s112_s1 = inlined_call_operand.vmem [shape: f32[6,1], index: 1, kind: input, shape index: {}]   ;;  %s113_s2 = inlined_call_operand.vmem [shape: f32[6,1], index: 2, kind: input, shape index: {}]   ;;  %s114_s3 = inlined_call_operand.hbm [shape: f32[6,256], index: 3, kind: output, shape index: {}]  }
   0x1   :  { %v17_v0 = vld [vmem:[%s112_s1] sm:$0x3f]  ;;  %51 = vset.pattern.permute.xlu0 %v74_v1 }
   0x2   :  { %8 = vsyncpa [#allocation3], 0  ;;  %20 = vperm.xlu0 %51, %v17_v0   ;;  %v25_v2 = vld [vmem:[%s113_s2] sm:$0x3f]  ;;  %v16_v5 = vld [vmem:[%s111_s0 + $0x8] sm:$0x3f] }
   0x3   :  { %v15_v4 = vld [vmem:[%s111_s0] sm:$0x3f]  ;;  %s75_s20 = smov [#allocation2]  }
   0x4   :  { %s41_s1 = sshll.u32 %s75_s20, 4  ;;  %s42_s1 = int_to_ptr.vmem [resolvable:$true] %s41_s1 }
   0x5   :  { %s52_s2 = scalar_lea.vmem %s42_s1, 256  ;;  %p57_p1 = scmp.lt.s32.totalorder %s42_s1, %s42_s1 }
   0x6   :  { %28 = vperm.xlu0 %51, %v25_v2   ;;  %p53_p0 = scmp.ne.s32.totalorder %s42_s1, %s52_s2  ;;  %p58_p2 = scmp.lt.s32.totalorder %s52_s2, %s52_s2 }
   0x8   :  { %p59_p3 = por %p58_p2, %p57_p1 }
   0xa   :  { %p60_p4 = pnand %p59_p3, %p53_p0 }
  0x7d   :  { %v21_v3 = vpop.permute.xlu0 %20 }
  0x7e   :  { %v23_v6 = vmul.f32 %v21_v3, %v15_v4  ;;  %v24_v7 = vmul.f32 %v21_v3, %v16_v5 }
  0x81   :  { %v29_v8 = vpop.permute.xlu0 %28 }
  0x82   :  { %v31_v9 = vadd.f32 %v29_v8, %v23_v6  ;;  %v32_v10 = vadd.f32 %v29_v8, %v24_v7 }
  0x84   :  { %33 = vst [vmem:[#allocation2] sm:$0x3f] %v31_v9  ;;  %34 = vst [vmem:[#allocation2 + $0x8] sm:$0x3f] %v32_v10 }
  0x85   :  { %63 = shalt.err (!%p60_p4)
}
  0x86   :  { %44 = dma.vmem_to_hbm [thread:$0]  %s42_s1, 256, %s114_s3, [#allocation3]  }
  0x87   :  { %72 = dma.done.wait [#allocation3], 256  }
  0x88   :  { %73 = vsyncadd [#allocation3], 4294967040 }
  0x89   :  { %48 = vsyncpa [#allocation3], 1 }

</bundles_post_ra>
